<compile_context>
chip_gen: v7x
topology: tpu7x:2x2x1
jax: 0.10.0
libtpu: 0.0.40
codegen_flags: <defaults>
</compile_context>

<pallas_src>
from functools import partial

import jax
import jax.numpy as jnp
from jax.experimental import pallas as pl
from jax.experimental.pallas import tpu as pltpu


def qnet_kernel(x_ref, w1_ref, b1_ref, w2_ref, b2_ref, w3_ref, b3_ref, o_ref,
                *, n_chunks):
    """One batch tile: 3x (MXU matmul -> f32 bias+ReLU), processed in row chunks."""
    tile_b = x_ref.shape[0]
    chunk = tile_b // n_chunks
    for c in range(n_chunks):                     # static unroll (n_chunks in {1,2,4})
        r0 = c * chunk                            # static offset, multiple of 8
        x = x_ref[pl.ds(r0, chunk), :]                                   # bf16
        h1 = jnp.dot(x, w1_ref[...], preferred_element_type=jnp.float32) + b1_ref[...]
        h1 = jnp.maximum(h1, 0.0)                                        # f32 (v5e-safe)
        h2 = jnp.dot(h1.astype(jnp.bfloat16), w2_ref[...],
                     preferred_element_type=jnp.float32) + b2_ref[...]
        h2 = jnp.maximum(h2, 0.0)                                        # f32
        out = jnp.dot(h2.astype(jnp.bfloat16), w3_ref[...],
                      preferred_element_type=jnp.float32) + b3_ref[...]
        o_ref[pl.ds(r0, chunk), :] = out.astype(o_ref.dtype)             # bf16 store


def _round_up(x, m):
    return ((x + m - 1) // m) * m


def _choose_tile_b(B):
    """Small B: just round up to 16.  Large B: biggest tile with >=2 grid steps."""
    if B <= 64:
        return max(16, _round_up(B, 16))
    return min(1024, _round_up((B + 1) // 2, 16))


def _choose_chunks(tile_b):
    """Row chunks per tile so MXU (chunk j) overlaps VPU epilogue (chunk j-1)."""
    for n in (4, 2):
        c = tile_b // n
        if tile_b % n == 0 and c % 8 == 0 and c >= 128:
            return n
    return 1


def prepare_params(params):
    """Once-per-parameter-update: bf16 weights, lane-pad the last layer to 128."""
    n_actions = params["w3"].shape[1]
    n_pad = _round_up(max(n_actions, 128), 128)
    return {
        "w1": params["w1"].astype(jnp.bfloat16),
        "b1": params["b1"].astype(jnp.float32),
        "w2": params["w2"].astype(jnp.bfloat16),
        "b2": params["b2"].astype(jnp.float32),
        "w3": jnp.pad(params["w3"], ((0, 0), (0, n_pad - n_actions))).astype(jnp.bfloat16),
        "b3": jnp.pad(params["b3"], ((0, 0), (0, n_pad - n_actions))).astype(jnp.float32),
    }


@partial(jax.jit, static_argnames=("n_actions",))
def qnetwork_forward(obs, prepped, *, n_actions):
    """obs: [B, obs_dim] f32.  prepped: output of prepare_params.  Returns [B, n_actions] f32."""
    w1, b1 = prepped["w1"], prepped["b1"]
    w2, b2 = prepped["w2"], prepped["b2"]
    w3, b3 = prepped["w3"], prepped["b3"]

    B, obs_dim = obs.shape
    hidden = w1.shape[1]
    n_pad = w3.shape[1]

    tile_b = _choose_tile_b(B)
    b_pad = _round_up(B, tile_b)
    n_chunks = _choose_chunks(tile_b)
    grid = (b_pad // tile_b,)

    obs_p = obs if b_pad == B else jnp.pad(obs, ((0, b_pad - B), (0, 0)))
    obs_bf = obs_p.astype(jnp.bfloat16)

    def resident_spec(a):
        # Constant index_map -> same block every grid step -> DMA'd once, VMEM-resident.
        return pl.BlockSpec(a.shape, lambda i: (0,) * a.ndim)

    flops = 2 * b_pad * (obs_dim * hidden + hidden * hidden + hidden * n_pad)
    bytes_accessed = (
        obs_bf.size * obs_bf.dtype.itemsize
        + sum(a.size * a.dtype.itemsize for a in (w1, b1, w2, b2, w3, b3))
        + b_pad * n_pad * 2                                   # bf16 output writeback
    )

    out_padded = pl.pallas_call(
        partial(qnet_kernel, n_chunks=n_chunks),
        out_shape=jax.ShapeDtypeStruct((b_pad, n_pad), jnp.bfloat16),
        grid=grid,
        in_specs=[
            pl.BlockSpec((tile_b, obs_dim), lambda i: (i, 0)),   # batch-tiled obs
            resident_spec(w1), resident_spec(b1),
            resident_spec(w2), resident_spec(b2),
            resident_spec(w3), resident_spec(b3),
        ],
        out_specs=pl.BlockSpec((tile_b, n_pad), lambda i: (i, 0)),
        compiler_params=pltpu.CompilerParams(
            dimension_semantics=("parallel",),        # v7x: shard batch tiles over 2 TCs
            vmem_limit_bytes=32 * 1024 * 1024,
        ),
        cost_estimate=pl.CostEstimate(
            flops=flops, transcendentals=0, bytes_accessed=bytes_accessed),
    )(obs_bf, w1, b1, w2, b2, w3, b3)

    # Strip batch / lane padding; hand downstream f32 Q-values.
    return out_padded[:B, :n_actions].astype(jnp.float32)


def init_params(key, obs_dim, n_actions, hidden_dim=256):
    """PyTorch nn.Linear-style init (uniform +/- 1/sqrt(fan_in)), f32 masters."""
    ks = jax.random.split(key, 6)

    def linear(kw, kb, fan_in, fan_out):
        bound = 1.0 / jnp.sqrt(jnp.float32(fan_in))
        w = jax.random.uniform(kw, (fan_in, fan_out), jnp.float32, -bound, bound)
        b = jax.random.uniform(kb, (1, fan_out), jnp.float32, -bound, bound)
        return w, b

    w1, b1 = linear(ks[0], ks[1], obs_dim, hidden_dim)
    w2, b2 = linear(ks[2], ks[3], hidden_dim, hidden_dim)
    w3, b3 = linear(ks[4], ks[5], hidden_dim, n_actions)
    return {"w1": w1, "b1": b1, "w2": w2, "b2": b2, "w3": w3, "b3": b3}


def qnetwork_reference(obs, p):
    """Pure-JAX reference mirroring the kernel's bf16-input / f32-acc / bf16-store numerics."""
    bf = lambda a: a.astype(jnp.bfloat16).astype(jnp.float32)
    h1 = jnp.maximum(bf(obs) @ bf(p["w1"]) + p["b1"], 0.0)
    h2 = jnp.maximum(bf(h1) @ bf(p["w2"]) + p["b2"], 0.0)
    out = bf(h2) @ bf(p["w3"]) + p["b3"]
    return out.astype(jnp.bfloat16).astype(jnp.float32)      # kernel stores bf16


if __name__ == "__main__":
    B, OBS_DIM, N_ACTIONS, HIDDEN = 8, 32, 8, 256

    key = jax.random.PRNGKey(0)
    k_params, k_obs = jax.random.split(key)
    params = init_params(k_params, OBS_DIM, N_ACTIONS, HIDDEN)
    obs = jax.random.normal(k_obs, (B, OBS_DIM), jnp.float32)

    prepped = prepare_params(params)                 # once per parameter update
    out = qnetwork_forward(obs, prepped, n_actions=N_ACTIONS)
    out = jax.block_until_ready(out)

    ref = qnetwork_reference(obs, params)
    assert out.shape == (B, N_ACTIONS)
    assert jnp.allclose(out, ref, atol=2e-2, rtol=2e-2), "mismatch vs reference"

    print("KERNEL_OK")
</pallas_src>

<mosaic_0001>
module attributes {stable_mosaic.version = 11 : i64} {
  func.func @qnet_kernel(%arg0: i32, %arg1: memref<16x32xbf16, #tpu.memory_space<vmem>>, %arg2: memref<32x256xbf16, #tpu.memory_space<vmem>>, %arg3: memref<1x256xf32, #tpu.memory_space<vmem>>, %arg4: memref<256x256xbf16, #tpu.memory_space<vmem>>, %arg5: memref<1x256xf32, #tpu.memory_space<vmem>>, %arg6: memref<256x128xbf16, #tpu.memory_space<vmem>>, %arg7: memref<1x128xf32, #tpu.memory_space<vmem>>, %arg8: memref<16x128xbf16, #tpu.memory_space<vmem>>) attributes {dimension_semantics = [#tpu.dimension_semantics<parallel>], iteration_bounds = array<i64: 1>, scalar_prefetch = 0 : i64, scratch_operands = 0 : i64, tpu.core_type = #tpu.core_type<tc>, window_params = [{transform_indices = @transform_0, window_bounds = array<i64: 16, 32>}, {pipeline_mode = #tpu.pipeline_mode<synchronous>, transform_indices = @transform_1, window_bounds = array<i64: 32, 256>}, {pipeline_mode = #tpu.pipeline_mode<synchronous>, transform_indices = @transform_2, window_bounds = array<i64: 1, 256>}, {pipeline_mode = #tpu.pipeline_mode<synchronous>, transform_indices = @transform_3, window_bounds = array<i64: 256, 256>}, {pipeline_mode = #tpu.pipeline_mode<synchronous>, transform_indices = @transform_4, window_bounds = array<i64: 1, 256>}, {pipeline_mode = #tpu.pipeline_mode<synchronous>, transform_indices = @transform_5, window_bounds = array<i64: 256, 128>}, {pipeline_mode = #tpu.pipeline_mode<synchronous>, transform_indices = @transform_6, window_bounds = array<i64: 1, 128>}, {transform_indices = @transform_7, window_bounds = array<i64: 16, 128>}]} {
    %c0 = arith.constant 0 : index
    %c0_0 = arith.constant 0 : index
    %0 = vector.load %arg1[%c0, %c0_0] : memref<16x32xbf16, #tpu.memory_space<vmem>>, vector<16x32xbf16>
    %c0_1 = arith.constant 0 : index
    %c0_2 = arith.constant 0 : index
    %1 = vector.load %arg2[%c0_1, %c0_2] : memref<32x256xbf16, #tpu.memory_space<vmem>>, vector<32x256xbf16>
    %cst = arith.constant dense<0.000000e+00> : vector<16x256xf32>
    %2 = tpu.matmul %0, %1, %cst {dimension_numbers = #tpu.dot_dimension_numbers<[1], [0], [0], [1], [0, 0, 1, 1], [], []>} : vector<16x32xbf16>, vector<32x256xbf16>, vector<16x256xf32> -> vector<16x256xf32>
    %c0_3 = arith.constant 0 : index
    %c0_4 = arith.constant 0 : index
    %3 = vector.load %arg3[%c0_3, %c0_4] : memref<1x256xf32, #tpu.memory_space<vmem>>, vector<1x256xf32>
    %4 = vector.broadcast %3 : vector<1x256xf32> to vector<16x256xf32>
    %5 = arith.addf %2, %4 : vector<16x256xf32>
    %cst_5 = arith.constant 0.000000e+00 : f32
    %6 = vector.broadcast %cst_5 : f32 to vector<16x256xf32>
    %7 = arith.maximumf %5, %6 : vector<16x256xf32>
    %8 = arith.truncf %7 : vector<16x256xf32> to vector<16x256xbf16>
    %c0_6 = arith.constant 0 : index
    %c0_7 = arith.constant 0 : index
    %9 = vector.load %arg4[%c0_6, %c0_7] : memref<256x256xbf16, #tpu.memory_space<vmem>>, vector<256x256xbf16>
    %cst_8 = arith.constant dense<0.000000e+00> : vector<16x256xf32>
    %10 = tpu.matmul %8, %9, %cst_8 {dimension_numbers = #tpu.dot_dimension_numbers<[1], [0], [0], [1], [0, 0, 1, 1], [], []>} : vector<16x256xbf16>, vector<256x256xbf16>, vector<16x256xf32> -> vector<16x256xf32>
    %c0_9 = arith.constant 0 : index
    %c0_10 = arith.constant 0 : index
    %11 = vector.load %arg5[%c0_9, %c0_10] : memref<1x256xf32, #tpu.memory_space<vmem>>, vector<1x256xf32>
    %12 = vector.broadcast %11 : vector<1x256xf32> to vector<16x256xf32>
    %13 = arith.addf %10, %12 : vector<16x256xf32>
    %cst_11 = arith.constant 0.000000e+00 : f32
    %14 = vector.broadcast %cst_11 : f32 to vector<16x256xf32>
    %15 = arith.maximumf %13, %14 : vector<16x256xf32>
    %16 = arith.truncf %15 : vector<16x256xf32> to vector<16x256xbf16>
    %c0_12 = arith.constant 0 : index
    %c0_13 = arith.constant 0 : index
    %17 = vector.load %arg6[%c0_12, %c0_13] : memref<256x128xbf16, #tpu.memory_space<vmem>>, vector<256x128xbf16>
    %cst_14 = arith.constant dense<0.000000e+00> : vector<16x128xf32>
    %18 = tpu.matmul %16, %17, %cst_14 {dimension_numbers = #tpu.dot_dimension_numbers<[1], [0], [0], [1], [0, 0, 1, 1], [], []>} : vector<16x256xbf16>, vector<256x128xbf16>, vector<16x128xf32> -> vector<16x128xf32>
    %c0_15 = arith.constant 0 : index
    %c0_16 = arith.constant 0 : index
    %19 = vector.load %arg7[%c0_15, %c0_16] : memref<1x128xf32, #tpu.memory_space<vmem>>, vector<1x128xf32>
    %20 = vector.broadcast %19 : vector<1x128xf32> to vector<16x128xf32>
    %21 = arith.addf %18, %20 : vector<16x128xf32>
    %22 = arith.truncf %21 : vector<16x128xf32> to vector<16x128xbf16>
    %c0_17 = arith.constant 0 : index
    %c0_18 = arith.constant 0 : index
    %23 = vector.load %arg8[%c0_17, %c0_18] : memref<16x128xbf16, #tpu.memory_space<vmem>>, vector<16x128xbf16>
    tpu.vector_store %arg8[%c0_17, %c0_18], %22 {strides = array<i32>} : memref<16x128xbf16, #tpu.memory_space<vmem>>, vector<16x128xbf16>,
    return
  }
  func.func @transform_0(%arg0: i32) -> (i32, i32) {
    %c0_i32 = arith.constant 0 : i32
    %c0_i32_0 = arith.constant 0 : i32
    return %arg0, %c0_i32 : i32, i32
  }
  func.func @transform_1(%arg0: i32) -> (i32, i32) {
    %c0_i32 = arith.constant 0 : i32
    %c0_i32_0 = arith.constant 0 : i32
    %c0_i32_1 = arith.constant 0 : i32
    return %c0_i32, %c0_i32_0 : i32, i32
  }
  func.func @transform_2(%arg0: i32) -> (i32, i32) {
    %c0_i32 = arith.constant 0 : i32
    %c0_i32_0 = arith.constant 0 : i32
    %c0_i32_1 = arith.constant 0 : i32
    return %c0_i32, %c0_i32_0 : i32, i32
  }
  func.func @transform_3(%arg0: i32) -> (i32, i32) {
    %c0_i32 = arith.constant 0 : i32
    %c0_i32_0 = arith.constant 0 : i32
    %c0_i32_1 = arith.constant 0 : i32
    return %c0_i32, %c0_i32_0 : i32, i32
  }
  func.func @transform_4(%arg0: i32) -> (i32, i32) {
    %c0_i32 = arith.constant 0 : i32
    %c0_i32_0 = arith.constant 0 : i32
    %c0_i32_1 = arith.constant 0 : i32
    return %c0_i32, %c0_i32_0 : i32, i32
  }
  func.func @transform_5(%arg0: i32) -> (i32, i32) {
    %c0_i32 = arith.constant 0 : i32
    %c0_i32_0 = arith.constant 0 : i32
    %c0_i32_1 = arith.constant 0 : i32
    return %c0_i32, %c0_i32_0 : i32, i32
  }
  func.func @transform_6(%arg0: i32) -> (i32, i32) {
    %c0_i32 = arith.constant 0 : i32
    %c0_i32_0 = arith.constant 0 : i32
    %c0_i32_1 = arith.constant 0 : i32
    return %c0_i32, %c0_i32_0 : i32, i32
  }
  func.func @transform_7(%arg0: i32) -> (i32, i32) {
    %c0_i32 = arith.constant 0 : i32
    %c0_i32_0 = arith.constant 0 : i32
    return %arg0, %c0_i32 : i32, i32
  }
}

</mosaic_0001>

<bundles_post_ra>
// kernel: qnetwork_forward.1
= control target key start
LH: loop header
LB: loop body
LE: loop exit
PB: predicated region body
PF: predicated region fallthrough
CT: control target
= control target key end

     0   :  { %12 = vsyncpa [#allocation3], 0  ;;  %s906_s0 = inlined_call_operand.vmem [shape: bf16[16,32], index: 0, kind: input, shape index: {}]   ;;  %s907_s1 = inlined_call_operand.vmem [shape: bf16[32,256], index: 1, kind: input, shape index: {}]   ;;  %s908_s2 = inlined_call_operand.vmem [shape: f32[1,256], index: 2, kind: input, shape index: {}]   ;;  %s909_s3 = inlined_call_operand.hbm [shape: bf16[256,256], index: 3, kind: input, shape index: {}]   ;;  %s910_s4 = inlined_call_operand.vmem [shape: f32[1,256], index: 4, kind: input, shape index: {}]   ;;  %s911_s5 = inlined_call_operand.hbm [shape: bf16[256,128], index: 5, kind: input, shape index: {}]   ;;  %s912_s6 = inlined_call_operand.vmem [shape: f32[1,128], index: 6, kind: input, shape index: {}]   ;;  %s913_s7 = inlined_call_operand.vmem [shape: bf16[16,128], index: 7, kind: output, shape index: {}]  }
   0x1   :  { %13 = vsyncpa [#allocation5], 0  ;;  %s808_s24 = smov [#allocation2]   ;;  %s760_s28 = scalar_lea.hbm %s909_s3, 4096 }
   0x2   :  { %s25_s25 = sshll.u32 %s808_s24, 4  ;;  %p761_p0 = scmp.ne.s32.totalorder %s909_s3, %s760_s28  ;;  %s26_s25 = int_to_ptr.vmem [resolvable:$true] %s25_s25 }
   0x3   :  { %p764_p1 = scmp.lt.u32.totalorder %s760_s28, %s909_s3 }
   0x5   :  { %p766_p2 = pnand %p764_p1, %p761_p0 }
   0x7   :  { %769 = shalt.err (!%p766_p2)
}
   0x8   :  { %s770_s10 = scalar_lea.vmem %s26_s25, 4096  ;;  %p775_p4 = scmp.lt.s32.totalorder %s26_s25, %s26_s25 }
   0x9   :  { %p771_p3 = scmp.ne.s32.totalorder %s26_s25, %s770_s10  ;;  %p776_p5 = scmp.lt.s32.totalorder %s770_s10, %s770_s10 }
   0xb   :  { %p777_p6 = por %p776_p5, %p775_p4 }
   0xd   :  { %p778_p7 = pnand %p777_p6, %p771_p3 }
   0xf   :  { %781 = shalt.err (!%p778_p7)
}
  0x10   :  { %s809_s11 = smov 128   ;;  %s810_s12 = smov 8  }
  0x11   :  { %31 = dma.hbm_to_vmem [thread:$0]  %s909_s3, 4096, %s26_s25, [#allocation3], %s809_s11, %s809_s11, %s810_s12  }
  0x12   :  { %s811_s15 = smov [#allocation4]   ;;  %s782_s19 = scalar_lea.hbm %s911_s5, 2048 }
  0x13   :  { %s39_s16 = sshll.u32 %s811_s15, 4  ;;  %p783_p8 = scmp.ne.s32.totalorder %s911_s5, %s782_s19  ;;  %s40_s16 = int_to_ptr.vmem [resolvable:$true] %s39_s16 }
  0x14   :  { %p786_p9 = scmp.lt.u32.totalorder %s782_s19, %s911_s5 }
  0x16   :  { %p788_p10 = pnand %p786_p9, %p783_p8 }
  0x18   :  { %791 = shalt.err (!%p788_p10)
}
  0x19   :  { %s792_s24 = scalar_lea.vmem %s40_s16, 2048  ;;  %p797_p12 = scmp.lt.s32.totalorder %s40_s16, %s40_s16 }
  0x1a   :  { %p793_p11 = scmp.ne.s32.totalorder %s40_s16, %s792_s24  ;;  %p798_p13 = scmp.lt.s32.totalorder %s792_s24, %s792_s24 }
  0x1c   :  { %p799_p0 = por %p798_p13, %p797_p12 }
  0x1e   :  { %p800_p1 = pnand %p799_p0, %p793_p11 }
  0x20   :  { %803 = shalt.err (!%p800_p1)
}
  0x21   :  { %s812_s3 = smov 64   ;;  %s813_s25 = smov 4  }
  0x22   :  { %45 = dma.hbm_to_vmem [thread:$0]  %s911_s5, 2048, %s40_s16, [#allocation5], %s812_s3, %s812_s3, %s813_s25  }
  0x23   :  { %804 = dma.done.wait [#allocation3], 4096  }
  0x24   :  { %805 = vsyncadd [#allocation3], 4294963200 }
  0x25   :  { %806 = dma.done.wait [#allocation5], 2048  }
  0x26   :  { %807 = vsyncadd [#allocation5], 4294965248  ;;  %v814_v0 = vmov 0   ;;  %v689_v1 = vld [vmem:[%s907_s1 + $0x4] ss:$8 sps:$4 sm:$0xff]   ;;  %vm98_vm0 = vcmask 261120   ;;  %v63_v49 = vlaneseq }
  0x27   :  { %134 = vmatprep.mubr.bf16.mxu0 %v814_v0  ;;  %v691_v2 = vld [vmem:[%s907_s1] ss:$8 sps:$4 sm:$0xff]   ;;  %102 = vmatprep.subr.bf16.mxu0 %v689_v1  ;;  %v692_v3 = vld [vmem:[%s907_s1 + $0x14] ss:$8 sps:$4 sm:$0xff]   ;;  %v694_v4 = vld [vmem:[%s907_s1 + $0x10] ss:$8 sps:$4 sm:$0xff]  }
  0x28   :  { %103 = vmatpush1.bf16.msra.mxu0 %v691_v2  ;;  %v696_v5 = vld [vmem:[#allocation2 + $0x4] ss:$8 sps:$4 sm:$0xff]   ;;  %v698_v6 = vld [vmem:[#allocation2] ss:$8 sps:$4 sm:$0xff]   ;;  %v699_v7 = vld [vmem:[#allocation2 + $0x14] ss:$8 sps:$4 sm:$0xff]  }
  0x29   :  { %104 = vmatprep.subr.bf16.mxu0 %v692_v3  ;;  %v695_v8 = vld [vmem:[%s906_s0] sm:$0xff]   ;;  %355 = vmatprep.subr.bf16.mxu1 %v696_v5  ;;  %v701_v9 = vld [vmem:[#allocation2 + $0x10] ss:$8 sps:$4 sm:$0xff]   ;;  %v705_v12 = vld [vmem:[#allocation2 + $0x34] ss:$8 sps:$4 sm:$0xff]   ;;  %v64_v50 = vshrl.u32 %v63_v49, 7 }
  0x2a   :  { %356 = vmatpush1.bf16.msra.mxu1 %v698_v6  ;;  %v702_v10 = vld [vmem:[#allocation2 + $0x24] ss:$8 sps:$4 sm:$0xff]   ;;  %v704_v11 = vld [vmem:[#allocation2 + $0x20] ss:$8 sps:$4 sm:$0xff]   ;;  %v707_v13 = vld [vmem:[#allocation2 + $0x30] ss:$8 sps:$4 sm:$0xff]  }
  0x2b   :  { %357 = vmatprep.subr.bf16.mxu1 %v699_v7  ;;  %v708_v14 = vld [vmem:[#allocation2 + $0x44] ss:$8 sps:$4 sm:$0xff]   ;;  %v710_v15 = vld [vmem:[#allocation2 + $0x40] ss:$8 sps:$4 sm:$0xff]   ;;  %v711_v16 = vld [vmem:[#allocation2 + $0x54] ss:$8 sps:$4 sm:$0xff]  }
  0x2c   :  { %105 = vmatpush1.bf16.msra.mxu0 %v694_v4  ;;  %v713_v17 = vld [vmem:[#allocation2 + $0x50] ss:$8 sps:$4 sm:$0xff]   ;;  %v714_v18 = vld [vmem:[#allocation2 + $0x64] ss:$8 sps:$4 sm:$0xff]   ;;  %v716_v19 = vld [vmem:[#allocation2 + $0x60] ss:$8 sps:$4 sm:$0xff]  }
  0x2d   :  { %v717_v20 = vld [vmem:[#allocation2 + $0x74] ss:$8 sps:$4 sm:$0xff]   ;;  %v719_v21 = vld [vmem:[#allocation2 + $0x70] ss:$8 sps:$4 sm:$0xff]   ;;  %v720_v22 = vld [vmem:[#allocation2 + $0x84] ss:$8 sps:$4 sm:$0xff]  }
  0x2e   :  { %358 = vmatpush1.bf16.msra.mxu1 %v701_v9  ;;  %v722_v23 = vld [vmem:[#allocation2 + $0x80] ss:$8 sps:$4 sm:$0xff]   ;;  %v723_v24 = vld [vmem:[#allocation2 + $0x94] ss:$8 sps:$4 sm:$0xff]   ;;  %v725_v25 = vld [vmem:[#allocation2 + $0x90] ss:$8 sps:$4 sm:$0xff]  }
  0x2f   :  { %601 = vmatmul.mubr.msk.bf16.vlgmr.msra.gmra.mrb[0].mxu0 %vm98_vm0, %v695_v8  ;;  %359 = vmatprep.subr.bf16.mxu1 %v702_v10  ;;  %v726_v26 = vld [vmem:[#allocation2 + $0xa4] ss:$8 sps:$4 sm:$0xff]   ;;  %v728_v27 = vld [vmem:[#allocation2 + $0xa0] ss:$8 sps:$4 sm:$0xff]   ;;  %v729_v28 = vld [vmem:[#allocation2 + $0xb4] ss:$8 sps:$4 sm:$0xff]  }
  0x30   :  { %v731_v29 = vld [vmem:[#allocation2 + $0xb0] ss:$8 sps:$4 sm:$0xff]   ;;  %v732_v30 = vld [vmem:[#allocation2 + $0xc4] ss:$8 sps:$4 sm:$0xff]   ;;  %v734_v31 = vld [vmem:[#allocation2 + $0xc0] ss:$8 sps:$4 sm:$0xff]  }
  0x31   :  { %v735_v32 = vld [vmem:[#allocation2 + $0xd4] ss:$8 sps:$4 sm:$0xff]   ;;  %v737_v33 = vld [vmem:[#allocation2 + $0xd0] ss:$8 sps:$4 sm:$0xff]   ;;  %v738_v34 = vld [vmem:[#allocation2 + $0xe4] ss:$8 sps:$4 sm:$0xff]  }
  0x32   :  { %360 = vmatpush1.bf16.msra.mxu1 %v704_v11  ;;  %v740_v35 = vld [vmem:[#allocation2 + $0xe0] ss:$8 sps:$4 sm:$0xff]   ;;  %v741_v36 = vld [vmem:[#allocation2 + $0xf4] ss:$8 sps:$4 sm:$0xff]   ;;  %v743_v37 = vld [vmem:[#allocation2 + $0xf0] ss:$8 sps:$4 sm:$0xff]  }
  0x33   :  { %361 = vmatprep.subr.bf16.mxu1 %v705_v12  ;;  %v744_v38 = vld [vmem:[#allocation4 + $0x40] sm:$0xff]   ;;  %v746_v40 = vld [vmem:[#allocation4 + $0x48] sm:$0xff]   ;;  %v748_v42 = vld [vmem:[#allocation4 + $0x50] sm:$0xff]   ;;  %v65_v51 = vsub.s32 0, %v64_v50  ;;  %v69_v53 = vsub.s32 1, %v64_v50 }
  0x34   :  { %v745_v39 = vld [vmem:[#allocation4] sm:$0xff]   ;;  %660 = vmatprep.subr.bf16.mxu0 %v744_v38  ;;  %v747_v41 = vld [vmem:[#allocation4 + $0x8] sm:$0xff]   ;;  %v749_v43 = vld [vmem:[#allocation4 + $0x10] sm:$0xff]  }
  0x35   :  { %661 = vmatpush3.bf16.msra.mxu0 %v745_v39  ;;  %v750_v44 = vld [vmem:[#allocation4 + $0x58] sm:$0xff]   ;;  %v752_v46 = vld [vmem:[#allocation4 + $0x60] sm:$0xff]   ;;  %v754_v48 = vld [vmem:[#allocation4 + $0x68] sm:$0xff]  }
  0x36   :  { %362 = vmatpush1.bf16.msra.mxu1 %v707_v13  ;;  %662 = vmatprep.subr.bf16.mxu0 %v746_v40  ;;  %v751_v45 = vld [vmem:[#allocation4 + $0x18] sm:$0xff]   ;;  %v753_v47 = vld [vmem:[#allocation4 + $0x20] sm:$0xff]   ;;  %v755_v6 = vld [vmem:[#allocation4 + $0x28] sm:$0xff]  }
  0x37   :  { %363 = vmatprep.subr.bf16.mxu1 %v708_v14  ;;  %v61_v52 = vld [vmem:[%s908_s2] sm:$0x3]  ;;  %v756_v7 = vld [vmem:[#allocation4 + $0x70] sm:$0xff]   ;;  %v758_v9 = vld [vmem:[#allocation4 + $0x78] sm:$0xff]  }
  0x38   :  { %v66_v54 = vrot.slane %v61_v52, %v65_v51  ;;  %v70_v55 = vrot.slane %v61_v52, %v69_v53  ;;  %v757_v8 = vld [vmem:[#allocation4 + $0x30] sm:$0xff]   ;;  %v759_v10 = vld [vmem:[#allocation4 + $0x38] sm:$0xff]   ;;  %v183_v11 = vld [vmem:[%s910_s4] sm:$0x3] }
  0x39   :  { %663 = vmatpush3.bf16.msra.mxu0 %v747_v41  ;;  %v188_v12 = vrot.slane %v183_v11, %v65_v51  ;;  %v192_v13 = vrot.slane %v183_v11, %v69_v53 }
  0x3a   :  { %364 = vmatpush1.bf16.msra.mxu1 %v710_v15  ;;  %664 = vmatprep.subr.bf16.mxu0 %v748_v42 }
  0x3b   :  { %365 = vmatprep.subr.bf16.mxu1 %v711_v16 }
  0x3d   :  { %665 = vmatpush3.bf16.msra.mxu0 %v749_v43 }
  0x3e   :  { %366 = vmatpush1.bf16.msra.mxu1 %v713_v17  ;;  %666 = vmatprep.subr.bf16.mxu0 %v750_v44 }
  0x3f   :  { %367 = vmatprep.subr.bf16.mxu1 %v714_v18 }
  0x41   :  { %667 = vmatpush3.bf16.msra.mxu0 %v751_v45 }
  0x42   :  { %368 = vmatpush1.bf16.msra.mxu1 %v716_v19  ;;  %668 = vmatprep.subr.bf16.mxu0 %v752_v46 }
  0x43   :  { %369 = vmatprep.subr.bf16.mxu1 %v717_v20 }
  0x45   :  { %669 = vmatpush3.bf16.msra.mxu0 %v753_v47 }
  0x46   :  { %370 = vmatpush1.bf16.msra.mxu1 %v719_v21  ;;  %670 = vmatprep.subr.bf16.mxu0 %v754_v48 }
  0x47   :  { %371 = vmatprep.subr.bf16.mxu1 %v720_v22 }
  0x49   :  { %671 = vmatpush3.bf16.msra.mxu0 %v755_v6 }
  0x4a   :  { %372 = vmatpush1.bf16.msra.mxu1 %v722_v23  ;;  %672 = vmatprep.subr.bf16.mxu0 %v756_v7 }
  0x4b   :  { %373 = vmatprep.subr.bf16.mxu1 %v723_v24 }
  0x4d   :  { %673 = vmatpush3.bf16.msra.mxu0 %v757_v8 }
  0x4e   :  { %374 = vmatpush1.bf16.msra.mxu1 %v725_v25  ;;  %674 = vmatprep.subr.bf16.mxu0 %v758_v9 }
  0x4f   :  { %375 = vmatprep.subr.bf16.mxu1 %v726_v26 }
  0x51   :  { %675 = vmatpush3.bf16.msra.mxu0 %v759_v10 }
  0x52   :  { %376 = vmatpush1.bf16.msra.mxu1 %v728_v27 }
  0x53   :  { %377 = vmatprep.subr.bf16.mxu1 %v729_v28 }
  0x56   :  { %378 = vmatpush1.bf16.msra.mxu1 %v731_v29 }
  0x57   :  { %379 = vmatprep.subr.bf16.mxu1 %v732_v30 }
  0x5a   :  { %380 = vmatpush1.bf16.msra.mxu1 %v734_v31 }
  0x5b   :  { %381 = vmatprep.subr.bf16.mxu1 %v735_v32  ;;  %v634_v32 = vld [vmem:[%s912_s6] ss:$0 sm:$0xff] }
  0x5e   :  { %382 = vmatpush1.bf16.msra.mxu1 %v737_v33 }
  0x5f   :  { %383 = vmatprep.subr.bf16.mxu1 %v738_v34 }
  0x62   :  { %384 = vmatpush1.bf16.msra.mxu1 %v740_v35 }
  0x63   :  { %385 = vmatprep.subr.bf16.mxu1 %v741_v36 }
  0x66   :  { %386 = vmatpush1.bf16.msra.mxu1 %v743_v37 }
 0x102   :  { %v136_v56 = vpop.f32.mrb[0].mxu0 }
 0x103   :  { %v137_v57 = vadd.f32 %v136_v56, %v66_v54  ;;  %v138_v58 = vpop.f32.mrb[1].mxu0 }
 0x104   :  { %v139_v59 = vadd.f32 %v138_v58, %v70_v55  ;;  %v140_v60 = vpop.f32.mrb[2].mxu0 }
 0x105   :  { %v141_v61 = vadd.f32 %v140_v60, %v66_v54  ;;  %v142_v62 = vpop.f32.mrb[3].mxu0  ;;  %v145_v0 = vmax.f32 %v137_v57, 0.0 }
 0x106   :  { %v143_v63 = vadd.f32 %v142_v62, %v70_v55  ;;  %v146_v2 = vmax.f32 %v139_v59, 0.0 }
 0x107   :  { %v147_v1 = vmax.f32 %v141_v61, 0.0 }
 0x108   :  { %v148_v3 = vmax.f32 %v143_v63, 0.0 }
 0x109   :  { %v149_v4 = vpack.c.bf16 %v147_v1, %v145_v0 }
 0x10a   :  { %v150_v5 = vpack.c.bf16 %v148_v3, %v146_v2 }
 0x10c   :  { %387 = vmatprep.mubr.bf16.mxu1 %v150_v5 }
 0x10d   :  { %388 = vmatmul.mubr.bf16.vlgmr.msra.gmra.mrb[0].mxu1 %v149_v4 }
 0x1e0   :  { %v389_v14 = vpop.f32.mrb[0].mxu1 }
 0x1e1   :  { %v390_v15 = vadd.f32 %v389_v14, %v188_v12  ;;  %v391_v16 = vpop.f32.mrb[1].mxu1 }
 0x1e2   :  { %v392_v17 = vadd.f32 %v391_v16, %v192_v13  ;;  %v393_v18 = vpop.f32.mrb[2].mxu1 }
 0x1e3   :  { %v394_v19 = vadd.f32 %v393_v18, %v188_v12  ;;  %v395_v20 = vpop.f32.mrb[3].mxu1  ;;  %v398_v22 = vmax.f32 %v390_v15, 0.0 }
 0x1e4   :  { %v396_v21 = vadd.f32 %v395_v20, %v192_v13  ;;  %v399_v24 = vmax.f32 %v392_v17, 0.0 }
 0x1e5   :  { %v400_v23 = vmax.f32 %v394_v19, 0.0 }
 0x1e6   :  { %v401_v25 = vmax.f32 %v396_v21, 0.0 }
 0x1e7   :  { %v402_v26 = vpack.c.bf16 %v400_v23, %v398_v22 }
 0x1e8   :  { %v403_v27 = vpack.c.bf16 %v401_v25, %v399_v24 }
 0x1ea   :  { %571 = vmatprep.mubr.bf16.mxu0 %v403_v27 }
 0x1eb   :  { %572 = vmatmul.mubr.bf16.vlgmr.msra.gmra.mrb[4].mxu0 %v402_v26 }
 0x2be   :  { %v676_v28 = vpop.f32.mrb[4].mxu0 }
 0x2bf   :  { %v677_v29 = vpop.f32.mrb[5].mxu0 }
 0x2c0   :  { %v678_v30 = vadd.f32 %v677_v29, %v676_v28  ;;  %v679_v31 = vpop.f32.mrb[6].mxu0 }
 0x2c1   :  { %v680_v33 = vpop.f32.mrb[7].mxu0 }
 0x2c2   :  { %v681_v34 = vadd.f32 %v680_v33, %v679_v31  ;;  %v574_v35 = vadd.f32 %v678_v30, %v634_v32 }
 0x2c4   :  { %v577_v36 = vadd.f32 %v681_v34, %v634_v32 }
 0x2c6   :  { %v658_v37 = vpack.c.bf16 %v577_v36, %v574_v35 }
 0x2c8   :  { %659 = vst [vmem:[%s913_s7] sm:$0xff] %v658_v37  }
 0x2c9   :  { %594 = vsyncpa [#allocation3], 1 }
 0x2ca   :  { %595 = vsyncpa [#allocation5], 1 }

</bundles_post_ra>
